<compile_context>
chip_gen: v5e
topology: v5e:2x2
jax: 0.10.0
libtpu: 0.0.40
codegen_flags: <defaults>
</compile_context>

<pallas_src>
import functools
import math

import jax
import jax.numpy as jnp
from jax.experimental import pallas as pl
from jax.experimental.pallas import tpu as pltpu


def _round_up(x, m):
    return (x + m - 1) // m * m


def _maxout_dims(in_features, out_features):
    in_pad = _round_up(in_features, 128)
    out_pad = _round_up(out_features, 128)
    return in_pad, out_pad


def maxout_kernel(x_ref, w_ref, b_ref, o_ref, acc_ref, *, pool_size):
    # x_ref: (tm, tk)  w_ref: (pool, tk, tn)  b_ref: (pool, 1, tn) f32
    # o_ref: (tm, tn)  acc_ref: (pool, tm, tn) f32 scratch
    k = pl.program_id(2)

    @pl.when(k == 0)
    def _():
        acc_ref[...] = jnp.zeros_like(acc_ref)

    x = x_ref[...]
    for p in range(pool_size):  # static, tiny (pool_size is usually 2)
        acc_ref[p] = acc_ref[p] + jnp.dot(
            x, w_ref[p], preferred_element_type=jnp.float32)

    @pl.when(k == pl.num_programs(2) - 1)
    def _():
        res = acc_ref[0] + b_ref[0]
        for p in range(1, pool_size):
            res = jnp.maximum(res, acc_ref[p] + b_ref[p])
        o_ref[...] = res.astype(o_ref.dtype)


def prepare_maxout_params(weight, bias, out_features, pool_size,
                          compute_dtype=None):
    """weight: (out*pool, in), bias: (out*pool,) -- PyTorch nn.Linear layout.

    Returns kernel-ready params. Call once at init time (NOT per forward);
    this is the only place the weight is rematerialized / permuted.
      w_prep: (pool, in_pad, out_pad)   per-pool GEMM operands (zero-padded)
      b_prep: (pool, 1, out_pad) f32    per-pool bias rows (zero-padded)
    """
    op, in_features = weight.shape
    assert op == out_features * pool_size
    in_pad, out_pad = _maxout_dims(in_features, out_features)

    # PyTorch fc output column j = o * pool + p  ->  w_prep[p, :, o]
    w3 = weight.reshape(out_features, pool_size, in_features)     # (o, p, in)
    w_prep = jnp.transpose(w3, (1, 2, 0))                         # (p, in, o)
    w_prep = jnp.pad(w_prep, ((0, 0),
                              (0, in_pad - in_features),
                              (0, out_pad - out_features)))
    if compute_dtype is not None:                                 # bf16 on v6e/v7x
        w_prep = w_prep.astype(compute_dtype)

    b_prep = bias.reshape(out_features, pool_size).T              # (p, o)
    b_prep = jnp.pad(b_prep, ((0, 0), (0, out_pad - out_features)))
    b_prep = b_prep.reshape(pool_size, 1, out_pad).astype(jnp.float32)
    return w_prep, b_prep


def maxout_forward(x, w_prep, b_prep, out_features, pool_size, *,
                   tm=256, compute_dtype=None):
    """x: (B, in_features). w_prep/b_prep from prepare_maxout_params."""
    B, in_features = x.shape
    pool, in_pad, out_pad = w_prep.shape
    assert pool == pool_size

    # Tile selection (all tiles 8-sublane / 128-lane aligned).
    tm_eff = min(tm, _round_up(B, 8))
    b_pad = _round_up(B, tm_eff)
    tn = math.gcd(out_pad, 256)                      # >=128, divides out_pad
    tk = in_pad if in_pad <= 2048 else math.gcd(in_pad, 512)

    xp = x.astype(compute_dtype) if compute_dtype is not None else x
    if (b_pad, in_pad) != (B, in_features):
        xp = jnp.pad(xp, ((0, b_pad - B), (0, in_pad - in_features)))

    grid = (b_pad // tm_eff, out_pad // tn, in_pad // tk)
    kernel = functools.partial(maxout_kernel, pool_size=pool_size)
    out_dtype = x.dtype

    flops = 2 * B * in_features * pool_size * out_features
    bytes_accessed = int(xp.size * xp.dtype.itemsize
                         + w_prep.size * w_prep.dtype.itemsize
                         + b_prep.size * b_prep.dtype.itemsize
                         + b_pad * out_pad * jnp.dtype(out_dtype).itemsize)

    out = pl.pallas_call(
        kernel,
        out_shape=jax.ShapeDtypeStruct((b_pad, out_pad), out_dtype),
        grid_spec=pltpu.PrefetchScalarGridSpec(
            num_scalar_prefetch=0,
            grid=grid,
            in_specs=[
                pl.BlockSpec((tm_eff, tk), lambda i, j, k: (i, k)),
                pl.BlockSpec((pool_size, tk, tn), lambda i, j, k: (0, k, j)),
                pl.BlockSpec((pool_size, 1, tn), lambda i, j, k: (0, 0, j)),
            ],
            out_specs=pl.BlockSpec((tm_eff, tn), lambda i, j, k: (i, j)),
            scratch_shapes=[pltpu.VMEM((pool_size, tm_eff, tn), jnp.float32)],
        ),
        compiler_params=pltpu.CompilerParams(
            dimension_semantics=("parallel", "parallel", "arbitrary"),
        ),
        cost_estimate=pl.CostEstimate(
            flops=flops, transcendentals=0, bytes_accessed=bytes_accessed),
    )(xp, w_prep, b_prep)

    return out[:B, :out_features]


def maxout_reference(x, weight, bias, out_features, pool_size):
    y = x @ weight.T + bias
    y = y.reshape(-1, out_features, pool_size)
    return jnp.max(y, axis=2)


def _run_case(key, B, in_features, out_features, pool_size, atol, rtol):
    kx, kw, kb = jax.random.split(key, 3)
    bound = 1.0 / jnp.sqrt(jnp.float32(in_features))
    weight = jax.random.uniform(
        kw, (out_features * pool_size, in_features), jnp.float32, -bound, bound)
    bias = jax.random.uniform(
        kb, (out_features * pool_size,), jnp.float32, -bound, bound)
    x = jax.random.normal(kx, (B, in_features), jnp.float32)

    w_prep, b_prep = prepare_maxout_params(weight, bias, out_features, pool_size)
    out = maxout_forward(x, w_prep, b_prep, out_features, pool_size)
    out = jax.block_until_ready(out)

    ref = maxout_reference(x, weight, bias, out_features, pool_size)
    assert out.shape == (B, out_features), out.shape
    assert jnp.allclose(out, ref, atol=atol, rtol=rtol), (
        f"mismatch vs reference (B={B}, in={in_features}, "
        f"out={out_features}, pool={pool_size})")


if __name__ == "__main__":
    key = jax.random.PRNGKey(0)
    k1, k2 = jax.random.split(key)

    # Small shape matching the module's defaults (pool_size=2).
    _run_case(k1, B=16, in_features=32, out_features=16, pool_size=2,
              atol=1e-5, rtol=1e-5)

    # Non-aligned shapes: exercises B/K/N padding, tail rows, and pool_size=3.
    _run_case(k2, B=300, in_features=200, out_features=40, pool_size=3,
              atol=1e-4, rtol=1e-4)

    print("KERNEL_OK")
</pallas_src>

<mosaic_0001>
module attributes {stable_mosaic.version = 11 : i64} {
  func.func @maxout_kernel(%arg0: i32, %arg1: i32, %arg2: i32, %arg3: memref<16x128xf32, #tpu.memory_space<vmem>>, %arg4: memref<2x128x128xf32, #tpu.memory_space<vmem>>, %arg5: memref<2x1x128xf32, #tpu.memory_space<vmem>>, %arg6: memref<16x128xf32, #tpu.memory_space<vmem>>, %arg7: memref<2x16x128xf32, #tpu.memory_space<vmem>>) attributes {dimension_semantics = [#tpu.dimension_semantics<parallel>, #tpu.dimension_semantics<parallel>, #tpu.dimension_semantics<arbitrary>], iteration_bounds = array<i64: 1, 1, 1>, scalar_prefetch = 0 : i64, scratch_operands = 1 : i64, tpu.core_type = #tpu.core_type<tc>, window_params = [{transform_indices = @transform_0, window_bounds = array<i64: 16, 128>}, {transform_indices = @transform_1, window_bounds = array<i64: 2, 128, 128>}, {transform_indices = @transform_2, window_bounds = array<i64: 2, 1, 128>}, {transform_indices = @transform_3, window_bounds = array<i64: 16, 128>}]} {
    %c0_i32 = arith.constant 0 : i32
    %0 = arith.cmpi eq, %arg2, %c0_i32 : i32
    %1 = arith.extui %0 : i1 to i32
    %c0_i32_0 = arith.constant 0 : i32
    %2 = arith.cmpi ne, %1, %c0_i32_0 : i32
    scf.if %2 {
      %cst_22 = arith.constant 0.000000e+00 : f32
      %25 = vector.broadcast %cst_22 : f32 to vector<2x16x128xf32>
      %c0_23 = arith.constant 0 : index
      %c0_24 = arith.constant 0 : index
      %c0_25 = arith.constant 0 : index
      %26 = vector.load %arg7[%c0_23, %c0_24, %c0_25] : memref<2x16x128xf32, #tpu.memory_space<vmem>>, vector<2x16x128xf32>
      tpu.vector_store %arg7[%c0_23, %c0_24, %c0_25], %25 {strides = array<i32>} : memref<2x16x128xf32, #tpu.memory_space<vmem>>, vector<2x16x128xf32>,
    } else {
    }
    %c0 = arith.constant 0 : index
    %c0_1 = arith.constant 0 : index
    %3 = vector.load %arg3[%c0, %c0_1] : memref<16x128xf32, #tpu.memory_space<vmem>>, vector<16x128xf32>
    %c0_2 = arith.constant 0 : index
    %c0_3 = arith.constant 0 : index
    %c0_4 = arith.constant 0 : index
    %4 = vector.load %arg7[%c0_2, %c0_3, %c0_4] : memref<2x16x128xf32, #tpu.memory_space<vmem>>, vector<1x16x128xf32>
    %5 = vector.shape_cast %4 : vector<1x16x128xf32> to vector<16x128xf32>
    %c0_5 = arith.constant 0 : index
    %c0_6 = arith.constant 0 : index
    %c0_7 = arith.constant 0 : index
    %6 = vector.load %arg4[%c0_5, %c0_6, %c0_7] : memref<2x128x128xf32, #tpu.memory_space<vmem>>, vector<1x128x128xf32>
    %7 = vector.shape_cast %6 : vector<1x128x128xf32> to vector<128x128xf32>
    %cst = arith.constant dense<0.000000e+00> : vector<16x128xf32>
    %8 = tpu.matmul %3, %7, %cst {dimension_numbers = #tpu.dot_dimension_numbers<[1], [0], [0], [1], [0, 0, 1, 1], [], []>} : vector<16x128xf32>, vector<128x128xf32>, vector<16x128xf32> -> vector<16x128xf32>
    %9 = arith.addf %5, %8 : vector<16x128xf32>
    %c0_8 = arith.constant 0 : index
    %c0_9 = arith.constant 0 : index
    %c0_10 = arith.constant 0 : index
    %10 = vector.load %arg7[%c0_8, %c0_9, %c0_10] : memref<2x16x128xf32, #tpu.memory_space<vmem>>, vector<1x16x128xf32>
    %11 = vector.shape_cast %10 : vector<1x16x128xf32> to vector<16x128xf32>
    %12 = vector.shape_cast %9 : vector<16x128xf32> to vector<1x16x128xf32>
    tpu.vector_store %arg7[%c0_8, %c0_9, %c0_10], %12 {strides = array<i32>} : memref<2x16x128xf32, #tpu.memory_space<vmem>>, vector<1x16x128xf32>,
    %c1 = arith.constant 1 : index
    %c0_11 = arith.constant 0 : index
    %c0_12 = arith.constant 0 : index
    %13 = vector.load %arg7[%c1, %c0_11, %c0_12] : memref<2x16x128xf32, #tpu.memory_space<vmem>>, vector<1x16x128xf32>
    %14 = vector.shape_cast %13 : vector<1x16x128xf32> to vector<16x128xf32>
    %c1_13 = arith.constant 1 : index
    %c0_14 = arith.constant 0 : index
    %c0_15 = arith.constant 0 : index
    %15 = vector.load %arg4[%c1_13, %c0_14, %c0_15] : memref<2x128x128xf32, #tpu.memory_space<vmem>>, vector<1x128x128xf32>
    %16 = vector.shape_cast %15 : vector<1x128x128xf32> to vector<128x128xf32>
    %cst_16 = arith.constant dense<0.000000e+00> : vector<16x128xf32>
    %17 = tpu.matmul %3, %16, %cst_16 {dimension_numbers = #tpu.dot_dimension_numbers<[1], [0], [0], [1], [0, 0, 1, 1], [], []>} : vector<16x128xf32>, vector<128x128xf32>, vector<16x128xf32> -> vector<16x128xf32>
    %18 = arith.addf %14, %17 : vector<16x128xf32>
    %c1_17 = arith.constant 1 : index
    %c0_18 = arith.constant 0 : index
    %c0_19 = arith.constant 0 : index
    %19 = vector.load %arg7[%c1_17, %c0_18, %c0_19] : memref<2x16x128xf32, #tpu.memory_space<vmem>>, vector<1x16x128xf32>
    %20 = vector.shape_cast %19 : vector<1x16x128xf32> to vector<16x128xf32>
    %21 = vector.shape_cast %18 : vector<16x128xf32> to vector<1x16x128xf32>
    tpu.vector_store %arg7[%c1_17, %c0_18, %c0_19], %21 {strides = array<i32>} : memref<2x16x128xf32, #tpu.memory_space<vmem>>, vector<1x16x128xf32>,
    %c0_i32_20 = arith.constant 0 : i32
    %22 = arith.cmpi eq, %arg2, %c0_i32_20 : i32
    %23 = arith.extui %22 : i1 to i32
    %c0_i32_21 = arith.constant 0 : i32
    %24 = arith.cmpi ne, %23, %c0_i32_21 : i32
    scf.if %24 {
      %c0_22 = arith.constant 0 : index
      %c0_23 = arith.constant 0 : index
      %c0_24 = arith.constant 0 : index
      %25 = vector.load %arg7[%c0_22, %c0_23, %c0_24] : memref<2x16x128xf32, #tpu.memory_space<vmem>>, vector<1x16x128xf32>
      %26 = vector.shape_cast %25 : vector<1x16x128xf32> to vector<16x128xf32>
      %c0_25 = arith.constant 0 : index
      %c0_26 = arith.constant 0 : index
      %c0_27 = arith.constant 0 : index
      %27 = vector.load %arg5[%c0_25, %c0_26, %c0_27] : memref<2x1x128xf32, #tpu.memory_space<vmem>>, vector<1x1x128xf32>
      %28 = vector.shape_cast %27 : vector<1x1x128xf32> to vector<1x128xf32>
      %29 = vector.broadcast %28 : vector<1x128xf32> to vector<16x128xf32>
      %30 = arith.addf %26, %29 : vector<16x128xf32>
      %c1_28 = arith.constant 1 : index
      %c0_29 = arith.constant 0 : index
      %c0_30 = arith.constant 0 : index
      %31 = vector.load %arg7[%c1_28, %c0_29, %c0_30] : memref<2x16x128xf32, #tpu.memory_space<vmem>>, vector<1x16x128xf32>
      %32 = vector.shape_cast %31 : vector<1x16x128xf32> to vector<16x128xf32>
      %c1_31 = arith.constant 1 : index
      %c0_32 = arith.constant 0 : index
      %c0_33 = arith.constant 0 : index
      %33 = vector.load %arg5[%c1_31, %c0_32, %c0_33] : memref<2x1x128xf32, #tpu.memory_space<vmem>>, vector<1x1x128xf32>
      %34 = vector.shape_cast %33 : vector<1x1x128xf32> to vector<1x128xf32>
      %35 = vector.broadcast %34 : vector<1x128xf32> to vector<16x128xf32>
      %36 = arith.addf %32, %35 : vector<16x128xf32>
      %37 = arith.maximumf %30, %36 : vector<16x128xf32>
      %c0_34 = arith.constant 0 : index
      %c0_35 = arith.constant 0 : index
      %38 = vector.load %arg6[%c0_34, %c0_35] : memref<16x128xf32, #tpu.memory_space<vmem>>, vector<16x128xf32>
      tpu.vector_store %arg6[%c0_34, %c0_35], %37 {strides = array<i32>} : memref<16x128xf32, #tpu.memory_space<vmem>>, vector<16x128xf32>,
    } else {
    }
    return
  }
  func.func @transform_0(%arg0: i32, %arg1: i32, %arg2: i32) -> (i32, i32) {
    %c0_i32 = arith.constant 0 : i32
    return %arg0, %arg2 : i32, i32
  }
  func.func @transform_1(%arg0: i32, %arg1: i32, %arg2: i32) -> (i32, i32, i32) {
    %c0_i32 = arith.constant 0 : i32
    %c0_i32_0 = arith.constant 0 : i32
    return %c0_i32, %arg2, %arg1 : i32, i32, i32
  }
  func.func @transform_2(%arg0: i32, %arg1: i32, %arg2: i32) -> (i32, i32, i32) {
    %c0_i32 = arith.constant 0 : i32
    %c0_i32_0 = arith.constant 0 : i32
    %c0_i32_1 = arith.constant 0 : i32
    return %c0_i32, %c0_i32_0, %arg1 : i32, i32, i32
  }
  func.func @transform_3(%arg0: i32, %arg1: i32, %arg2: i32) -> (i32, i32) {
    %c0_i32 = arith.constant 0 : i32
    return %arg0, %arg1 : i32, i32
  }
}

</mosaic_0001>

<bundles_post_ra>
// kernel: tpu_custom_call.1
= control target key start
LH: loop header
LB: loop body
LE: loop exit
PB: predicated region body
PF: predicated region fallthrough
CT: control target
= control target key end

     0   :  { %8 = vsyncpa [#allocation4], 0  ;;  %s401_s0 = inlined_call_operand.hbm [shape: f32[16,128], index: 0, kind: input, shape index: {}]   ;;  %s402_s1 = inlined_call_operand.hbm [shape: f32[2,128,128], index: 1, kind: input, shape index: {}]   ;;  %s403_s2 = inlined_call_operand.hbm [shape: f32[2,1,128], index: 2, kind: input, shape index: {}]   ;;  %s404_s3 = inlined_call_operand.hbm [shape: f32[16,128], index: 3, kind: output, shape index: {}]  }
   0x1   :  { %9 = vsyncpa [#allocation7], 0 }
   0x2   :  { %10 = vsyncpa [#allocation5], 0  ;;  %s28_s14 = sshll.u32 %s402_s1, 4  ;;  %s352_s15 = smov [#allocation6]   ;;  %s29_s14 = int_to_ptr.hbm [resolvable:$true] %s28_s14 }
   0x3   :  { %s30_s16 = sshll.u32 %s352_s15, 4  ;;  %s15_s19 = sshll.u32 %s401_s0, 4  ;;  %s31_s16 = int_to_ptr.vmem [resolvable:$true] %s30_s16  ;;  %s16_s19 = int_to_ptr.hbm [resolvable:$true] %s15_s19 }
   0x4   :  { %s353_s20 = smov 128   ;;  %s354_s21 = smov 8  }
   0x5   :  { %36 = dma.hbm_to_vmem [thread:$0]  %s29_s14, 4096, %s31_s16, [#allocation7], %s353_s20, %s353_s20, %s354_s21  }
   0x6   :  { %s355_s22 = smov [#allocation3]   ;;  %s41_s1 = sshll.u32 %s403_s2, 4  ;;  %s42_s1 = int_to_ptr.hbm [resolvable:$true] %s41_s1 }
   0x7   :  { %s17_s23 = sshll.u32 %s355_s22, 4  ;;  %s356_s0 = smov [#allocation8]   ;;  %s18_s23 = int_to_ptr.vmem [resolvable:$true] %s17_s23 }
   0x8   :  { %23 = dma.hbm_to_vmem [thread:$0]  %s16_s19, 256, %s18_s23, [#allocation4], %s353_s20, %s353_s20, %s354_s21  }
   0x9   :  { %s43_s26 = sshll.u32 %s356_s0, 4  ;;  %s357_s27 = smov 16   ;;  %s44_s26 = int_to_ptr.vmem [resolvable:$true] %s43_s26 }
   0xa   :  { %s358_s28 = smov 1  }
   0xb   :  { %49 = dma.hbm_to_vmem [thread:$0]  %s42_s1, 32, %s44_s26, [#allocation7], %s357_s27, %s357_s27, %s358_s28  }
   0xc   :  { %346 = dma.done.wait [#allocation4], 256  }
   0xd   :  { %347 = vsyncadd [#allocation4], 4294967040 }
   0xe   :  { %348 = dma.done.wait [#allocation7], 4128  }
   0xf   :  { %349 = vsyncadd [#allocation7], 4294963168  ;;  %v89_v0 = vld [vmem:[#allocation6 + $0x78] sm:$0xff]  ;;  %v88_v2 = vld [vmem:[#allocation6 + $0x70] sm:$0xff]  ;;  %s359_s2 = smov [#allocation9]   ;;  %s194_s5 = sshll.u32 %s404_s3, 4  ;;  %s195_s5 = int_to_ptr.hbm [resolvable:$true] %s194_s5 }
  0x10   :  { %v136_v1 = vld [vmem:[#allocation6 + $0xf8] sm:$0xff]  ;;  %208 = vmatpush.msra.mxu2 %v89_v0  ;;  %v135_v3 = vld [vmem:[#allocation6 + $0xf0] sm:$0xff]  ;;  %v87_v4 = vld [vmem:[#allocation6 + $0x68] sm:$0xff]  ;;  %90 = vmatpush.msra.mxu0 %v89_v0  ;;  %s192_s29 = sshll.u32 %s359_s2, 4  ;;  %s193_s29 = int_to_ptr.vmem [resolvable:$true] %s192_s29 }
  0x11   :  { %224 = vmatpush.msra.mxu3 %v136_v1  ;;  %v134_v5 = vld [vmem:[#allocation6 + $0xe8] sm:$0xff]  ;;  %137 = vmatpush.msra.mxu1 %v136_v1  ;;  %v86_v6 = vld [vmem:[#allocation6 + $0x60] sm:$0xff]  ;;  %v85_v8 = vld [vmem:[#allocation6 + $0x58] sm:$0xff] }
  0x12   :  { %209 = vmatpush.msra.mxu2 %v88_v2  ;;  %v133_v7 = vld [vmem:[#allocation6 + $0xe0] sm:$0xff]  ;;  %91 = vmatpush.msra.mxu0 %v88_v2  ;;  %v132_v9 = vld [vmem:[#allocation6 + $0xd8] sm:$0xff]  ;;  %v84_v10 = vld [vmem:[#allocation6 + $0x50] sm:$0xff] }
  0x13   :  { %225 = vmatpush.msra.mxu3 %v135_v3  ;;  %138 = vmatpush.msra.mxu1 %v135_v3  ;;  %v131_v11 = vld [vmem:[#allocation6 + $0xd0] sm:$0xff]  ;;  %v83_v12 = vld [vmem:[#allocation6 + $0x48] sm:$0xff]  ;;  %v82_v14 = vld [vmem:[#allocation6 + $0x40] sm:$0xff] }
  0x14   :  { %210 = vmatpush.msra.mxu2 %v87_v4  ;;  %92 = vmatpush.msra.mxu0 %v87_v4  ;;  %v130_v13 = vld [vmem:[#allocation6 + $0xc8] sm:$0xff]  ;;  %v129_v15 = vld [vmem:[#allocation6 + $0xc0] sm:$0xff]  ;;  %v81_v16 = vld [vmem:[#allocation6 + $0x38] sm:$0xff] }
  0x15   :  { %226 = vmatpush.msra.mxu3 %v134_v5  ;;  %139 = vmatpush.msra.mxu1 %v134_v5  ;;  %v128_v17 = vld [vmem:[#allocation6 + $0xb8] sm:$0xff]  ;;  %v80_v18 = vld [vmem:[#allocation6 + $0x30] sm:$0xff]  ;;  %v79_v20 = vld [vmem:[#allocation6 + $0x28] sm:$0xff] }
  0x16   :  { %211 = vmatpush.msra.mxu2 %v86_v6  ;;  %93 = vmatpush.msra.mxu0 %v86_v6  ;;  %v127_v19 = vld [vmem:[#allocation6 + $0xb0] sm:$0xff]  ;;  %v126_v21 = vld [vmem:[#allocation6 + $0xa8] sm:$0xff]  ;;  %v78_v22 = vld [vmem:[#allocation6 + $0x20] sm:$0xff] }
  0x17   :  { %227 = vmatpush.msra.mxu3 %v133_v7  ;;  %140 = vmatpush.msra.mxu1 %v133_v7  ;;  %v125_v23 = vld [vmem:[#allocation6 + $0xa0] sm:$0xff]  ;;  %v77_v24 = vld [vmem:[#allocation6 + $0x18] sm:$0xff]  ;;  %v76_v26 = vld [vmem:[#allocation6 + $0x10] sm:$0xff] }
  0x18   :  { %212 = vmatpush.msra.mxu2 %v85_v8  ;;  %94 = vmatpush.msra.mxu0 %v85_v8  ;;  %v124_v25 = vld [vmem:[#allocation6 + $0x98] sm:$0xff]  ;;  %v123_v27 = vld [vmem:[#allocation6 + $0x90] sm:$0xff]  ;;  %v75_v28 = vld [vmem:[#allocation6 + $0x8] sm:$0xff] }
  0x19   :  { %228 = vmatpush.msra.mxu3 %v132_v9  ;;  %141 = vmatpush.msra.mxu1 %v132_v9  ;;  %v122_v29 = vld [vmem:[#allocation6 + $0x88] sm:$0xff]  ;;  %v74_v30 = vld [vmem:[#allocation6] sm:$0xff]  ;;  %v71_v32 = vld [vmem:[#allocation3 + $0x8] sm:$0xff] }
  0x1a   :  { %213 = vmatpush.msra.mxu2 %v84_v10  ;;  %95 = vmatpush.msra.mxu0 %v84_v10  ;;  %v121_v31 = vld [vmem:[#allocation6 + $0x80] sm:$0xff]  ;;  %v70_v33 = vld [vmem:[#allocation3] sm:$0xff] }
  0x1b   :  { %229 = vmatpush.msra.mxu3 %v131_v11  ;;  %142 = vmatpush.msra.mxu1 %v131_v11  ;;  %v248_v34 = vld [vmem:[#allocation8] ss:$0 sm:$0xff]  ;;  %v249_v35 = vld [vmem:[#allocation8 + $0x1] ss:$0 sm:$0xff] }
  0x1c   :  { %214 = vmatpush.msra.mxu2 %v83_v12  ;;  %96 = vmatpush.msra.mxu0 %v83_v12 }
  0x1d   :  { %230 = vmatpush.msra.mxu3 %v130_v13  ;;  %143 = vmatpush.msra.mxu1 %v130_v13 }
  0x1e   :  { %215 = vmatpush.msra.mxu2 %v82_v14  ;;  %97 = vmatpush.msra.mxu0 %v82_v14 }
  0x1f   :  { %231 = vmatpush.msra.mxu3 %v129_v15  ;;  %144 = vmatpush.msra.mxu1 %v129_v15 }
  0x20   :  { %216 = vmatpush.msra.mxu2 %v81_v16  ;;  %98 = vmatpush.msra.mxu0 %v81_v16 }
  0x21   :  { %232 = vmatpush.msra.mxu3 %v128_v17  ;;  %145 = vmatpush.msra.mxu1 %v128_v17 }
  0x22   :  { %217 = vmatpush.msra.mxu2 %v80_v18  ;;  %99 = vmatpush.msra.mxu0 %v80_v18 }
  0x23   :  { %233 = vmatpush.msra.mxu3 %v127_v19  ;;  %146 = vmatpush.msra.mxu1 %v127_v19 }
  0x24   :  { %218 = vmatpush.msra.mxu2 %v79_v20  ;;  %100 = vmatpush.msra.mxu0 %v79_v20 }
  0x25   :  { %234 = vmatpush.msra.mxu3 %v126_v21  ;;  %147 = vmatpush.msra.mxu1 %v126_v21 }
  0x26   :  { %219 = vmatpush.msra.mxu2 %v78_v22  ;;  %101 = vmatpush.msra.mxu0 %v78_v22 }
  0x27   :  { %235 = vmatpush.msra.mxu3 %v125_v23  ;;  %148 = vmatpush.msra.mxu1 %v125_v23 }
  0x28   :  { %220 = vmatpush.msra.mxu2 %v77_v24  ;;  %102 = vmatpush.msra.mxu0 %v77_v24 }
  0x29   :  { %236 = vmatpush.msra.mxu3 %v124_v25  ;;  %149 = vmatpush.msra.mxu1 %v124_v25 }
  0x2a   :  { %221 = vmatpush.msra.mxu2 %v76_v26  ;;  %103 = vmatpush.msra.mxu0 %v76_v26 }
  0x2b   :  { %237 = vmatpush.msra.mxu3 %v123_v27  ;;  %150 = vmatpush.msra.mxu1 %v123_v27 }
  0x2c   :  { %222 = vmatpush.msra.mxu2 %v75_v28  ;;  %104 = vmatpush.msra.mxu0 %v75_v28 }
  0x2d   :  { %238 = vmatpush.msra.mxu3 %v122_v29  ;;  %151 = vmatpush.msra.mxu1 %v122_v29 }
  0x2e   :  { %223 = vmatpush.msra.mxu2 %v74_v30  ;;  %105 = vmatpush.msra.mxu0 %v74_v30 }
  0x2f   :  { %239 = vmatpush.msra.mxu3 %v121_v31  ;;  %109 = vmatmul.f32.vlgmr.msra.gmra.mxu2 %v71_v32 }
  0x30   :  { %156 = vmatmul.f32.vlgmr.msra.gmra.mxu3 %v71_v32  ;;  %152 = vmatpush.msra.mxu1 %v121_v31 }
  0x31   :  { %106 = vmatmul.f32.vlgmr.msra.gmra.mxu0 %v70_v33  ;;  %153 = vmatmul.f32.vlgmr.msra.gmra.mxu1 %v70_v33 }
  0xae   :  { %v107_v36 = vpop.f32.mrf.mxu0  ;;  %v154_v37 = vpop.f32.mrf.mxu1 }
  0xaf   :  { %v173_v38 = vadd.f32 %v248_v34, %v107_v36  ;;  %v182_v39 = vadd.f32 %v249_v35, %v154_v37 }
  0xb1   :  { %v184_v40 = vmax.f32 %v173_v38, %v182_v39 }
  0xb2   :  { %v110_v41 = vpop.f32.mrf.mxu2 }
  0xb3   :  { %v157_v42 = vpop.f32.mrf.mxu3  ;;  %v174_v43 = vadd.f32 %v248_v34, %v110_v41  ;;  %186 = vst [vmem:[#allocation9] sm:$0xff] %v184_v40 }
  0xb4   :  { %v183_v44 = vadd.f32 %v249_v35, %v157_v42 }
  0xb6   :  { %v185_v45 = vmax.f32 %v174_v43, %v183_v44 }
  0xb8   :  { %187 = vst [vmem:[#allocation9 + $0x8] sm:$0xff] %v185_v45 }
  0xb9   :  { %200 = dma.vmem_to_hbm [thread:$0]  %s193_s29, 256, %s195_s5, [#allocation5], %s353_s20, %s353_s20, %s354_s21  }
  0xba   :  { %350 = dma.done.wait [#allocation5], 256  }
  0xbb   :  { %351 = vsyncadd [#allocation5], 4294967040 }
  0xbc   :  { %205 = vsyncpa [#allocation4], 1 }
  0xbd   :  { %206 = vsyncpa [#allocation7], 1 }
  0xbe   :  { %207 = vsyncpa [#allocation5], 1 }

</bundles_post_ra>
